<compile_context>
chip_gen: v6e
topology: v6e:2x2x1
jax: 0.10.0
libtpu: 0.0.40
codegen_flags: <defaults>
</compile_context>

<pallas_src>
from functools import partial

import jax
import jax.numpy as jnp
from jax.experimental import pallas as pl
from jax.experimental.pallas import tpu as pltpu


_MAX_TILE = 4096  # lanes; keeps h (hidden x tile x 4B) and x/out double-buffers tiny


def _round_up(v, m):
    return ((v + m - 1) // m) * m


def _tensorcores_per_chip():
    """Heuristic: 2 TCs on v4/v5p/v7x, 1 elsewhere (perf-only decision)."""
    try:
        kind = jax.devices()[0].device_kind.lower()
    except Exception:
        return 1
    if ("lite" in kind) or ("v5e" in kind) or ("v6e" in kind) or ("v2" in kind) or ("v3" in kind):
        return 1
    if ("v4" in kind) or ("v5" in kind) or ("v7" in kind) or ("7x" in kind):
        return 2
    return 1


def _pick_tile(n):
    """Tile (lane width) so the grid has 1 step on single-TC chips, >=2 even
    blocks on dual-TC chips, capped at _MAX_TILE lanes."""
    n_pad = _round_up(max(int(n), 1), 128)
    if _tensorcores_per_chip() >= 2 and n_pad >= 256:
        tile = _round_up(pl.cdiv(n_pad, 2), 128)   # 2 balanced blocks -> both TCs busy
    else:
        tile = n_pad                               # 1 TC: grid is a serial loop, 1 step
    return int(min(tile, _MAX_TILE))


def _make_mlp_kernel(n_linear, layer0_vpu, mxu_bf16):
    """Kernel over refs: (x, w0, b0, ..., w_{L-1}, b_{L-1}, out).

    x_ref:   (in_dim, tile)   -- batch on lanes
    w_ref_l: (d_out, d_in)    -- PyTorch Linear layout (bf16 for MXU layers)
    b_ref_l: (d_out, 1)       -- f32, broadcasts over the lane (batch) axis
    out_ref: (out_dim, tile)
    """

    def kernel(*refs):
        x_ref = refs[0]
        out_ref = refs[-1]
        h = x_ref[...]                                  # (in_dim, tile) f32
        for l in range(n_linear):                       # unrolled
            w = refs[1 + 2 * l][...]                    # (d_out, d_in)
            b = refs[2 + 2 * l][...]                    # (d_out, 1) f32
            if l == 0 and layer0_vpu:
                # d_in is tiny (e.g. 2): VPU broadcast mul/adds beat a K=2 MXU pass.
                d_in = w.shape[1]
                acc = w[:, 0:1] * h[0:1, :]
                for j in range(1, d_in):
                    acc = acc + w[:, j:j + 1] * h[j:j + 1, :]
                h = acc + b
            else:
                if mxu_bf16:
                    w = w.astype(jnp.bfloat16)          # no-op if pre-cast in wrapper
                    h = h.astype(jnp.bfloat16)
                h = jnp.dot(w, h, preferred_element_type=jnp.float32) + b
            if l < n_linear - 1:                        # Tanh after all but last
                h = jnp.tanh(h)                         # f32 EUP tanh (see TODO)
        out_ref[...] = h.astype(out_ref.dtype)

    return kernel


@partial(jax.jit, static_argnames=("tile", "mxu_bf16"))
def _deepmod_forward_impl(x, params, *, tile, mxu_bf16):
    N, in_dim = x.shape
    out_dim = params[-1][0].shape[0]
    n_linear = len(params)

    n_blocks = pl.cdiv(N, tile)
    n_pad = n_blocks * tile
    layer0_vpu = in_dim <= 4

    # Lane-dense layout: features on sublanes, batch on lanes. Pad + transpose
    # fuse under jit (no separate eager dispatches).
    x_t = jnp.pad(x.T.astype(jnp.float32), ((0, 0), (0, n_pad - N)))

    in_specs = [pl.BlockSpec((in_dim, tile), lambda i: (0, i))]
    args = [x_t]
    weight_bytes = 0
    for l, (w, b) in enumerate(params):
        w = w.astype(jnp.float32)
        b = jnp.reshape(b.astype(jnp.float32), (-1, 1))
        if mxu_bf16 and not (l == 0 and layer0_vpu):
            w = w.astype(jnp.bfloat16)                  # halves weight DMA per step
        # Full-array blocks (block_shape == array shape), constant index map.
        in_specs.append(pl.BlockSpec(w.shape, lambda i: (0, 0)))
        in_specs.append(pl.BlockSpec(b.shape, lambda i: (0, 0)))
        args.append(w)
        args.append(b)
        weight_bytes += w.size * w.dtype.itemsize + b.size * 4

    out_specs = pl.BlockSpec((out_dim, tile), lambda i: (0, i))

    flops = 2 * n_pad * sum(int(w.shape[0]) * int(w.shape[1]) for w, _ in params)
    transcendentals = n_pad * sum(int(w.shape[0]) for w, _ in params[:-1])
    bytes_accessed = n_pad * (in_dim + out_dim) * 4 + n_blocks * weight_bytes

    fn = pl.pallas_call(
        _make_mlp_kernel(n_linear, layer0_vpu, mxu_bf16),
        out_shape=jax.ShapeDtypeStruct((out_dim, n_pad), jnp.float32),
        grid_spec=pl.GridSpec(
            grid=(n_blocks,),
            in_specs=in_specs,
            out_specs=out_specs,
        ),
        compiler_params=pltpu.CompilerParams(
            dimension_semantics=("parallel",)),
        cost_estimate=pl.CostEstimate(
            flops=int(flops),
            transcendentals=int(transcendentals),
            bytes_accessed=int(bytes_accessed)),
    )
    out_t = fn(*args)                                   # (out_dim, n_pad), lane-dense stores
    return out_t[:, :N].T                               # slice + transpose fuse under jit


def deepmod_forward(x, params, *, tile=None, mxu_bf16=True):
    """DeepMod MLP forward pass via a Pallas TPU kernel.

    x:      (N, input_dim) float32 collocation points
    params: list of (W, b), W of shape (d_out, d_in), b of shape (d_out, 1)
            (torch.nn.Linear layout).
    Returns (N, output_dim) float32.
    """
    if tile is None:
        tile = _pick_tile(x.shape[0])
    params = tuple((w, b) for (w, b) in params)
    return _deepmod_forward_impl(x, params, tile=int(tile), mxu_bf16=bool(mxu_bf16))


def init_deepmod_params(key, input_dim, hidden_dim, layers, output_dim):
    """Init matching torch.nn.Linear default: U(-1/sqrt(fan_in), 1/sqrt(fan_in)).

    Weights in PyTorch layout (d_out, d_in); biases as (d_out, 1).
    """
    dims = [input_dim] + [hidden_dim] * (layers + 1) + [output_dim]
    params = []
    for d_in, d_out in zip(dims[:-1], dims[1:]):
        key, kw, kb = jax.random.split(key, 3)
        bound = 1.0 / jnp.sqrt(jnp.float32(d_in))
        w = jax.random.uniform(kw, (d_out, d_in), jnp.float32, -bound, bound)
        b = jax.random.uniform(kb, (d_out, 1), jnp.float32, -bound, bound)
        params.append((w, b))
    return params


def reference_forward(x, params, *, mxu_bf16=True):
    """Pure-JAX reference mimicking the kernel's math (for correctness check).

    With mxu_bf16=False it is the plain f32 MLP."""
    h = x
    n = len(params)
    in_dim = x.shape[1]
    for i, (w, b) in enumerate(params):
        b_row = jnp.reshape(b, (1, -1))
        if i == 0 and in_dim <= 4:
            acc = h[:, 0:1] * w[:, 0][None, :]
            for j in range(1, w.shape[1]):
                acc = acc + h[:, j:j + 1] * w[:, j][None, :]
            h = acc + b_row
        elif mxu_bf16:
            h = jnp.dot(h.astype(jnp.bfloat16), w.astype(jnp.bfloat16).T,
                        preferred_element_type=jnp.float32) + b_row
        else:
            h = jnp.dot(h, w.T, preferred_element_type=jnp.float32) + b_row
        if i < n - 1:
            h = jnp.tanh(h)
    return h


if __name__ == "__main__":
    # DeepMod config: input_dim=2 (x, t), hidden_dim=32, layers=2, output_dim=1.
    input_dim, hidden_dim, layers, output_dim = 2, 32, 2, 1
    N = 1000   # deliberately NOT a multiple of 128 -> exercises the padding path

    key = jax.random.PRNGKey(0)
    key, kx = jax.random.split(key)
    x = jax.random.normal(kx, (N, input_dim), jnp.float32)

    params = init_deepmod_params(key, input_dim, hidden_dim, layers, output_dim)

    out = deepmod_forward(x, params)           # jitted: pad/slice/transpose fused
    out = jax.block_until_ready(out)
    assert out.shape == (N, output_dim)

    # Tight check vs a reference computed at matched (mixed) precision.
    ref_match = reference_forward(x, params, mxu_bf16=True)
    assert jnp.allclose(out, ref_match, atol=1e-4, rtol=1e-4), \
        "mismatch vs matched-precision reference"

    # Sanity check: bf16 MXU path stays close to the pure-f32 network.
    ref_f32 = reference_forward(x, params, mxu_bf16=False)
    assert jnp.allclose(out, ref_f32, atol=5e-2, rtol=5e-2), \
        "bf16 path diverged from f32 reference"

    print("KERNEL_OK")
</pallas_src>

<mosaic_0001>
module attributes {stable_mosaic.version = 11 : i64} {
  func.func @kernel(%arg0: i32, %arg1: memref<2x1024xf32, #tpu.memory_space<vmem>>, %arg2: memref<32x2xf32, #tpu.memory_space<vmem>>, %arg3: memref<32x1xf32, #tpu.memory_space<vmem>>, %arg4: memref<32x32xbf16, #tpu.memory_space<vmem>>, %arg5: memref<32x1xf32, #tpu.memory_space<vmem>>, %arg6: memref<32x32xbf16, #tpu.memory_space<vmem>>, %arg7: memref<32x1xf32, #tpu.memory_space<vmem>>, %arg8: memref<1x32xbf16, #tpu.memory_space<vmem>>, %arg9: memref<1x1xf32, #tpu.memory_space<vmem>>, %arg10: memref<1x1024xf32, #tpu.memory_space<vmem>>) attributes {dimension_semantics = [#tpu.dimension_semantics<parallel>], iteration_bounds = array<i64: 1>, scalar_prefetch = 0 : i64, scratch_operands = 0 : i64, tpu.core_type = #tpu.core_type<tc>, window_params = [{transform_indices = @transform_0, window_bounds = array<i64: 2, 1024>}, {pipeline_mode = #tpu.pipeline_mode<synchronous>, transform_indices = @transform_1, window_bounds = array<i64: 32, 2>}, {pipeline_mode = #tpu.pipeline_mode<synchronous>, transform_indices = @transform_2, window_bounds = array<i64: 32, 1>}, {pipeline_mode = #tpu.pipeline_mode<synchronous>, transform_indices = @transform_3, window_bounds = array<i64: 32, 32>}, {pipeline_mode = #tpu.pipeline_mode<synchronous>, transform_indices = @transform_4, window_bounds = array<i64: 32, 1>}, {pipeline_mode = #tpu.pipeline_mode<synchronous>, transform_indices = @transform_5, window_bounds = array<i64: 32, 32>}, {pipeline_mode = #tpu.pipeline_mode<synchronous>, transform_indices = @transform_6, window_bounds = array<i64: 32, 1>}, {pipeline_mode = #tpu.pipeline_mode<synchronous>, transform_indices = @transform_7, window_bounds = array<i64: 1, 32>}, {pipeline_mode = #tpu.pipeline_mode<synchronous>, transform_indices = @transform_8, window_bounds = array<i64: 1, 1>}, {transform_indices = @transform_9, window_bounds = array<i64: 1, 1024>}]} {
    %c0 = arith.constant 0 : index
    %c0_0 = arith.constant 0 : index
    %0 = vector.load %arg1[%c0, %c0_0] : memref<2x1024xf32, #tpu.memory_space<vmem>>, vector<2x1024xf32>
    %c0_1 = arith.constant 0 : index
    %c0_2 = arith.constant 0 : index
    %1 = vector.load %arg2[%c0_1, %c0_2] : memref<32x2xf32, #tpu.memory_space<vmem>>, vector<32x2xf32>
    %c0_3 = arith.constant 0 : index
    %c0_4 = arith.constant 0 : index
    %2 = vector.load %arg3[%c0_3, %c0_4] : memref<32x1xf32, #tpu.memory_space<vmem>>, vector<32x1xf32>
    %3 = vector.extract_strided_slice %1 {offsets = [0, 0], sizes = [32, 1], strides = [1, 1]} : vector<32x2xf32> to vector<32x1xf32>
    %4 = vector.extract_strided_slice %0 {offsets = [0, 0], sizes = [1, 1024], strides = [1, 1]} : vector<2x1024xf32> to vector<1x1024xf32>
    %5 = vector.broadcast %3 : vector<32x1xf32> to vector<32x1024xf32>
    %6 = vector.broadcast %4 : vector<1x1024xf32> to vector<32x1024xf32>
    %7 = arith.mulf %5, %6 : vector<32x1024xf32>
    %8 = vector.extract_strided_slice %1 {offsets = [0, 1], sizes = [32, 1], strides = [1, 1]} : vector<32x2xf32> to vector<32x1xf32>
    %9 = vector.extract_strided_slice %0 {offsets = [1, 0], sizes = [1, 1024], strides = [1, 1]} : vector<2x1024xf32> to vector<1x1024xf32>
    %10 = vector.broadcast %8 : vector<32x1xf32> to vector<32x1024xf32>
    %11 = vector.broadcast %9 : vector<1x1024xf32> to vector<32x1024xf32>
    %12 = arith.mulf %10, %11 : vector<32x1024xf32>
    %13 = arith.addf %7, %12 : vector<32x1024xf32>
    %14 = vector.broadcast %2 : vector<32x1xf32> to vector<32x1024xf32>
    %15 = arith.addf %13, %14 : vector<32x1024xf32>
    %16 = math.tanh %15 : vector<32x1024xf32>
    %c0_5 = arith.constant 0 : index
    %c0_6 = arith.constant 0 : index
    %17 = vector.load %arg4[%c0_5, %c0_6] : memref<32x32xbf16, #tpu.memory_space<vmem>>, vector<32x32xbf16>
    %c0_7 = arith.constant 0 : index
    %c0_8 = arith.constant 0 : index
    %18 = vector.load %arg5[%c0_7, %c0_8] : memref<32x1xf32, #tpu.memory_space<vmem>>, vector<32x1xf32>
    %19 = arith.truncf %16 : vector<32x1024xf32> to vector<32x1024xbf16>
    %cst = arith.constant dense<0.000000e+00> : vector<32x1024xf32>
    %20 = tpu.matmul %17, %19, %cst {dimension_numbers = #tpu.dot_dimension_numbers<[1], [0], [0], [1], [0, 0, 1, 1], [], []>} : vector<32x32xbf16>, vector<32x1024xbf16>, vector<32x1024xf32> -> vector<32x1024xf32>
    %21 = vector.broadcast %18 : vector<32x1xf32> to vector<32x1024xf32>
    %22 = arith.addf %20, %21 : vector<32x1024xf32>
    %23 = math.tanh %22 : vector<32x1024xf32>
    %c0_9 = arith.constant 0 : index
    %c0_10 = arith.constant 0 : index
    %24 = vector.load %arg6[%c0_9, %c0_10] : memref<32x32xbf16, #tpu.memory_space<vmem>>, vector<32x32xbf16>
    %c0_11 = arith.constant 0 : index
    %c0_12 = arith.constant 0 : index
    %25 = vector.load %arg7[%c0_11, %c0_12] : memref<32x1xf32, #tpu.memory_space<vmem>>, vector<32x1xf32>
    %26 = arith.truncf %23 : vector<32x1024xf32> to vector<32x1024xbf16>
    %cst_13 = arith.constant dense<0.000000e+00> : vector<32x1024xf32>
    %27 = tpu.matmul %24, %26, %cst_13 {dimension_numbers = #tpu.dot_dimension_numbers<[1], [0], [0], [1], [0, 0, 1, 1], [], []>} : vector<32x32xbf16>, vector<32x1024xbf16>, vector<32x1024xf32> -> vector<32x1024xf32>
    %28 = vector.broadcast %25 : vector<32x1xf32> to vector<32x1024xf32>
    %29 = arith.addf %27, %28 : vector<32x1024xf32>
    %30 = math.tanh %29 : vector<32x1024xf32>
    %c0_14 = arith.constant 0 : index
    %c0_15 = arith.constant 0 : index
    %31 = vector.load %arg8[%c0_14, %c0_15] : memref<1x32xbf16, #tpu.memory_space<vmem>>, vector<1x32xbf16>
    %c0_16 = arith.constant 0 : index
    %c0_17 = arith.constant 0 : index
    %32 = vector.load %arg9[%c0_16, %c0_17] : memref<1x1xf32, #tpu.memory_space<vmem>>, vector<1x1xf32>
    %33 = arith.truncf %30 : vector<32x1024xf32> to vector<32x1024xbf16>
    %cst_18 = arith.constant dense<0.000000e+00> : vector<1x1024xf32>
    %34 = tpu.matmul %31, %33, %cst_18 {dimension_numbers = #tpu.dot_dimension_numbers<[1], [0], [0], [1], [0, 0, 1, 1], [], []>} : vector<1x32xbf16>, vector<32x1024xbf16>, vector<1x1024xf32> -> vector<1x1024xf32>
    %35 = vector.broadcast %32 : vector<1x1xf32> to vector<1x1024xf32>
    %36 = arith.addf %34, %35 : vector<1x1024xf32>
    %c0_19 = arith.constant 0 : index
    %c0_20 = arith.constant 0 : index
    %37 = vector.load %arg10[%c0_19, %c0_20] : memref<1x1024xf32, #tpu.memory_space<vmem>>, vector<1x1024xf32>
    tpu.vector_store %arg10[%c0_19, %c0_20], %36 {strides = array<i32>} : memref<1x1024xf32, #tpu.memory_space<vmem>>, vector<1x1024xf32>,
    return
  }
  func.func @transform_0(%arg0: i32) -> (i32, i32) {
    %c0_i32 = arith.constant 0 : i32
    %c0_i32_0 = arith.constant 0 : i32
    return %c0_i32, %arg0 : i32, i32
  }
  func.func @transform_1(%arg0: i32) -> (i32, i32) {
    %c0_i32 = arith.constant 0 : i32
    %c0_i32_0 = arith.constant 0 : i32
    %c0_i32_1 = arith.constant 0 : i32
    return %c0_i32, %c0_i32_0 : i32, i32
  }
  func.func @transform_2(%arg0: i32) -> (i32, i32) {
    %c0_i32 = arith.constant 0 : i32
    %c0_i32_0 = arith.constant 0 : i32
    %c0_i32_1 = arith.constant 0 : i32
    return %c0_i32, %c0_i32_0 : i32, i32
  }
  func.func @transform_3(%arg0: i32) -> (i32, i32) {
    %c0_i32 = arith.constant 0 : i32
    %c0_i32_0 = arith.constant 0 : i32
    %c0_i32_1 = arith.constant 0 : i32
    return %c0_i32, %c0_i32_0 : i32, i32
  }
  func.func @transform_4(%arg0: i32) -> (i32, i32) {
    %c0_i32 = arith.constant 0 : i32
    %c0_i32_0 = arith.constant 0 : i32
    %c0_i32_1 = arith.constant 0 : i32
    return %c0_i32, %c0_i32_0 : i32, i32
  }
  func.func @transform_5(%arg0: i32) -> (i32, i32) {
    %c0_i32 = arith.constant 0 : i32
    %c0_i32_0 = arith.constant 0 : i32
    %c0_i32_1 = arith.constant 0 : i32
    return %c0_i32, %c0_i32_0 : i32, i32
  }
  func.func @transform_6(%arg0: i32) -> (i32, i32) {
    %c0_i32 = arith.constant 0 : i32
    %c0_i32_0 = arith.constant 0 : i32
    %c0_i32_1 = arith.constant 0 : i32
    return %c0_i32, %c0_i32_0 : i32, i32
  }
  func.func @transform_7(%arg0: i32) -> (i32, i32) {
    %c0_i32 = arith.constant 0 : i32
    %c0_i32_0 = arith.constant 0 : i32
    %c0_i32_1 = arith.constant 0 : i32
    return %c0_i32, %c0_i32_0 : i32, i32
  }
  func.func @transform_8(%arg0: i32) -> (i32, i32) {
    %c0_i32 = arith.constant 0 : i32
    %c0_i32_0 = arith.constant 0 : i32
    %c0_i32_1 = arith.constant 0 : i32
    return %c0_i32, %c0_i32_0 : i32, i32
  }
  func.func @transform_9(%arg0: i32) -> (i32, i32) {
    %c0_i32 = arith.constant 0 : i32
    %c0_i32_0 = arith.constant 0 : i32
    return %c0_i32, %arg0 : i32, i32
  }
}

</mosaic_0001>

<bundles_post_ra>
// kernel: _deepmod_forward_impl.1
= control target key start
LH: loop header
LB: loop body
LE: loop exit
PB: predicated region body
PF: predicated region fallthrough
CT: control target
= control target key end

     0   :  { %v1502_v0 = vmov 1   ;;  %v2076_v5 = vmov 0   ;;  %v67_v20 = vlaneseq  ;;  %vm461_vm0 = vcmask 261120   ;;  %s2066_s1 = inlined_call_operand.vmem [shape: f32[32,2], index: 1, kind: input, shape index: {}]   ;;  %s2067_s8 = inlined_call_operand.<no memory space> [shape: f32[1,1], index: 8, kind: input, shape index: {}]   ;;  %s2068_s2 = inlined_call_operand.vmem [shape: f32[32,1], index: 2, kind: input, shape index: {}]   ;;  %s2069_s4 = inlined_call_operand.vmem [shape: f32[32,1], index: 4, kind: input, shape index: {}]   ;;  %s2070_s6 = inlined_call_operand.vmem [shape: f32[32,1], index: 6, kind: input, shape index: {}]   ;;  %s2071_s3 = inlined_call_operand.vmem [shape: bf16[32,32], index: 3, kind: input, shape index: {}]   ;;  %s2072_s0 = inlined_call_operand.vmem [shape: f32[2,1024], index: 0, kind: input, shape index: {}]   ;;  %s2073_s5 = inlined_call_operand.vmem [shape: bf16[32,32], index: 5, kind: input, shape index: {}]   ;;  %s2074_s7 = inlined_call_operand.vmem [shape: bf16[1,32], index: 7, kind: input, shape index: {}]   ;;  %s2075_s9 = inlined_call_operand.vmem [shape: f32[1,1024], index: 9, kind: output, shape index: {}]  }
   0x1   :  { %1302 = vset.pattern.permute.xlu0 %v1502_v0  ;;  %1300 = vset.pattern.permute.xlu1 %v1502_v0  ;;  %v39_v1 = vld [vmem:[%s2066_s1 + $0x10] sm:$0xff]  ;;  %v37_v2 = vld [vmem:[%s2066_s1] sm:$0xff]  ;;  %v14_v3 = vstv %s2067_s8  ;;  %v40_v4 = vld [vmem:[%s2066_s1 + $0x18] sm:$0xff] }
   0x2   :  { %180 = vperm.xlu1 %1300, %v39_v1   ;;  %172 = vperm.xlu0 %1302, %v37_v2   ;;  %15 = vst [vmem:[#allocation2] sm:$0x1] %v14_v3  ;;  %v38_v6 = vld [vmem:[%s2066_s1 + $0x8] sm:$0xff]  ;;  %v44_v7 = vld [vmem:[%s2068_s2 + $0x18] sm:$0xff]  ;;  %v43_v8 = vld [vmem:[%s2068_s2 + $0x10] sm:$0xff]  ;;  %v1611_v21 = vshrl.u32 %v67_v20, 7 }
   0x3   :  { %500 = vmatprep.mubr.bf16.mxu0 %v2076_v5  ;;  %553 = vmatprep.mubr.bf16.mxu1 %v2076_v5  ;;  %v413_v9 = vld [vmem:[%s2069_s4 + $0x10] sm:$0xff]  ;;  %v41_v10 = vld [vmem:[%s2068_s2] sm:$0xff]  ;;  %v42_v12 = vld [vmem:[%s2068_s2 + $0x8] sm:$0xff] }
   0x4   :  { %v411_v11 = vld [vmem:[%s2069_s4] sm:$0xff]  ;;  %v718_v13 = vld [vmem:[%s2070_s6 + $0x10] sm:$0xff]  ;;  %v414_v14 = vld [vmem:[%s2069_s4 + $0x18] sm:$0xff]  ;;  %2081 = vst [vmem:[#allocation3_spill] sm:$0xff] %v1611_v21  ;;  %v189_v22 = vsub.s32 1, %v1611_v21  ;;  %v197_v23 = vsub.s32 5, %v1611_v21 }
   0x5   :  { %v716_v15 = vld [vmem:[%s2070_s6] sm:$0xff]  ;;  %v412_v16 = vld [vmem:[%s2069_s4 + $0x8] sm:$0xff]  ;;  %v719_v18 = vld [vmem:[%s2070_s6 + $0x18] sm:$0xff]  ;;  %v193_v24 = vsub.s32 3, %v1611_v21  ;;  %v201_v25 = vsub.s32 7, %v1611_v21  ;;  %v1626_v30 = vsub.s32 0, %v1611_v21 }
   0x6   :  { %184 = vperm.xlu1 %1300, %v40_v4   ;;  %1303 = vset.pattern.permute.xlu0 %v2076_v5  ;;  %v717_v19 = vld [vmem:[%s2070_s6 + $0x8] sm:$0xff]  ;;  %v35_v26 = vld [vmem:[%s2072_s0] sm:$0xff]  ;;  %v77_v31 = vsub.s32 4, %v1611_v21  ;;  %v73_v32 = vsub.s32 2, %v1611_v21  ;;  %v81_v33 = vsub.s32 6, %v1611_v21 }
   0x7   :  { %57 = vperm.xlu0 %1303, %v39_v1   ;;  %v36_v27 = vld [vmem:[%s2072_s0 + $0x8] sm:$0xff]  ;;  %2083 = vst [vmem:[#allocation5_spill] sm:$0xff] %v1626_v30  ;;  %v190_v34 = vrot.slane %v35_v26, %v189_v22  ;;  %v198_v35 = vrot.slane %v35_v26, %v197_v23  ;;  %v194_v40 = vrot.slane %v35_v26, %v193_v24 }
   0x8   :  { %v206_v36 = vrot.slane %v36_v27, %v189_v22  ;;  %v210_v37 = vrot.slane %v36_v27, %v193_v24  ;;  %v214_v38 = vrot.slane %v36_v27, %v197_v23  ;;  %v218_v39 = vrot.slane %v36_v27, %v201_v25 }
   0x9   :  { %v1017_v17 = vld [vmem:[#allocation2] sm:$0x1]  ;;  %v202_v41 = vrot.slane %v35_v26, %v201_v25  ;;  %v70_v43 = vrot.slane %v35_v26, %v1626_v30  ;;  %v78_v44 = vrot.slane %v35_v26, %v77_v31  ;;  %v86_v45 = vrot.slane %v36_v27, %v1626_v30 }
   0xa   :  { %1301 = vset.pattern.permute.xlu1 %v2076_v5  ;;  %v90_v47 = vrot.slane %v36_v27, %v73_v32  ;;  %v94_v48 = vrot.slane %v36_v27, %v77_v31  ;;  %v98_v49 = vrot.slane %v36_v27, %v81_v33  ;;  %v74_v50 = vrot.slane %v35_v26, %v73_v32 }
   0xb   :  { %52 = vperm.xlu1 %1301, %v38_v6   ;;  %62 = vperm.xlu0 %1303, %v40_v4   ;;  %v1635_v51 = vrot.slane %v190_v34, %v189_v22  ;;  %v1637_v52 = vrot.slane %v198_v35, %v189_v22  ;;  %v1639_v53 = vrot.slane %v206_v36, %v189_v22 }
   0xc   :  { %v82_v54 = vrot.slane %v35_v26, %v81_v33  ;;  %v1641_v55 = vrot.slane %v210_v37, %v189_v22  ;;  %v1643_v56 = vrot.slane %v214_v38, %v189_v22  ;;  %v1645_v57 = vrot.slane %v218_v39, %v189_v22 }
   0xd   :  { %v1647_v58 = vrot.slane %v194_v40, %v189_v22  ;;  %v1649_v59 = vrot.slane %v202_v41, %v189_v22  ;;  %v1652_v60 = vrot.slane %v70_v43, %v1626_v30  ;;  %v1655_v61 = vrot.slane %v78_v44, %v1626_v30 }
   0xe   :  { %v1658_v62 = vrot.slane %v86_v45, %v1626_v30  ;;  %v1661_v63 = vrot.slane %v90_v47, %v1626_v30  ;;  %v1667_v1 = vrot.slane %v98_v49, %v1626_v30  ;;  %v1672_v3 = vrot.slane %v74_v50, %v1626_v30 }
   0xf   :  { %1304 = vset.pattern.permute.xlu1 %v1502_v0  ;;  %47 = vperm.xlu0 %1303, %v37_v2   ;;  %v1664_v0 = vrot.slane %v94_v48, %v1626_v30 }
  0x10   :  { %176 = vperm.xlu1 %1304, %v38_v6  }
  0x13   :  { %340 = vperm.xlu0 %1303, %v44_v7  }
  0x14   :  { %1305 = vset.pattern.permute.xlu1 %v2076_v5 }
  0x15   :  { %335 = vperm.xlu1 %1305, %v43_v8  }
  0x17   :  { %443 = vperm.xlu0 %1303, %v413_v9   ;;  %v1680_v9 = vrot.slane %v82_v54, %v1626_v30 }
  0x19   :  { %325 = vperm.xlu1 %1305, %v41_v10  }
  0x1b   :  { %433 = vperm.xlu0 %1303, %v411_v11  }
  0x1d   :  { %330 = vperm.xlu1 %1305, %v42_v12  }
  0x1f   :  { %748 = vperm.xlu0 %1303, %v718_v13  }
  0x21   :  { %448 = vperm.xlu1 %1305, %v414_v14  }
  0x23   :  { %738 = vperm.xlu0 %1303, %v716_v15  }
  0x25   :  { %438 = vperm.xlu1 %1305, %v412_v16  }
  0x27   :  { %1036 = vperm.xlu0 %1303, %v1017_v17  }
  0x29   :  { %753 = vperm.xlu1 %1305, %v719_v18  }
  0x2d   :  { %743 = vperm.xlu1 %1305, %v717_v19  }
  0x7d   :  { %v181_v28 = vpop.permute.xlu1 %180  ;;  %v1623_v29 = vpop.permute.xlu0 %172 }
  0x7e   :  { %2082 = vst [vmem:[#allocation4_spill] sm:$0xff] %v1623_v29  ;;  %v275_v6 = vmul.f32 %v1635_v51, %v181_v28  ;;  %v277_v7 = vmul.f32 %v1637_v52, %v181_v28  ;;  %v279_v8 = vmul.f32 %v1639_v53, %v181_v28  ;;  %v1683_v10 = vmul.f32 %v1641_v55, %v181_v28 }
  0x7f   :  { %v281_v11 = vmul.f32 %v1643_v56, %v181_v28  ;;  %v1687_v12 = vmul.f32 %v1645_v57, %v181_v28  ;;  %v1691_v13 = vmul.f32 %v1635_v51, %v1623_v29  ;;  %v1695_v14 = vmul.f32 %v1647_v58, %v1623_v29 }
  0x80   :  { %v1699_v15 = vmul.f32 %v1637_v52, %v1623_v29  ;;  %v1703_v16 = vmul.f32 %v1649_v59, %v1623_v29  ;;  %v263_v17 = vmul.f32 %v1639_v53, %v1623_v29  ;;  %v1709_v18 = vmul.f32 %v1641_v55, %v1623_v29 }
  0x81   :  { %v1631_v42 = vpop.permute.xlu1 %184  ;;  %v1713_v19 = vmul.f32 %v1645_v57, %v1623_v29  ;;  %v276_v22 = vmul.f32 %v1647_v58, %v181_v28  ;;  %v278_v23 = vmul.f32 %v1649_v59, %v181_v28 }
  0x82   :  { %v58_v46 = vpop.permute.xlu0 %57  ;;  %2084 = vst [vmem:[#allocation6_spill] sm:$0xff] %v1709_v18  ;;  %v1721_v24 = vmul.f32 %v1635_v51, %v1631_v42  ;;  %v1725_v25 = vmul.f32 %v1637_v52, %v1631_v42  ;;  %v287_v32 = vmul.f32 %v1639_v53, %v1631_v42  ;;  %v1737_v28 = vmul.f32 %v1641_v55, %v1631_v42 }
  0x83   :  { %2085 = vst [vmem:[#allocation7_spill] sm:$0xff] %v1713_v19  ;;  %v159_v33 = vmul.f32 %v1658_v62, %v58_v46  ;;  %v161_v34 = vmul.f32 %v1664_v0, %v58_v46  ;;  %v289_v35 = vmul.f32 %v1643_v56, %v1631_v42  ;;  %v1745_v36 = vmul.f32 %v1645_v57, %v1631_v42 }
  0x84   :  { %v155_v37 = vmul.f32 %v1652_v60, %v58_v46  ;;  %v157_v38 = vmul.f32 %v1655_v61, %v58_v46  ;;  %v1750_v39 = vmul.f32 %v1661_v63, %v58_v46  ;;  %v1753_v40 = vmul.f32 %v1667_v1, %v58_v46 }
  0x85   :  { %2086 = vst [vmem:[#allocation8_spill] sm:$0xff] %v1745_v36  ;;  %v156_v43 = vmul.f32 %v1672_v3, %v58_v46  ;;  %v284_v44 = vmul.f32 %v1647_v58, %v1631_v42  ;;  %v158_v49 = vmul.f32 %v1680_v9, %v58_v46  ;;  %v311_v54 = vadd.f32 %v279_v8, %v159_v33 }
  0x86   :  { %v1669_v2 = vpop.permute.xlu1 %52  ;;  %v1674_v4 = vpop.permute.xlu0 %62  ;;  %v313_v5 = vadd.f32 %v281_v11, %v161_v34  ;;  %v286_v30 = vmul.f32 %v1649_v59, %v1631_v42  ;;  %v307_v18 = vadd.f32 %v275_v6, %v155_v37  ;;  %v309_v36 = vadd.f32 %v277_v7, %v157_v38 }
  0x87   :  { %v167_v26 = vmul.f32 %v1658_v62, %v1674_v4  ;;  %v169_v27 = vmul.f32 %v1664_v0, %v1674_v4  ;;  %v164_v21 = vmul.f32 %v1672_v3, %v1674_v4  ;;  %v148_v46 = vmul.f32 %v1672_v3, %v1669_v2 }
  0x88   :  { %v308_v11 = vadd.f32 %v276_v22, %v156_v43  ;;  %v151_v7 = vmul.f32 %v1658_v62, %v1669_v2  ;;  %v153_v22 = vmul.f32 %v1664_v0, %v1669_v2  ;;  %v310_v38 = vadd.f32 %v278_v23, %v158_v49 }
  0x89   :  { %v319_v47 = vadd.f32 %v287_v32, %v167_v26  ;;  %v321_v48 = vadd.f32 %v289_v35, %v169_v27  ;;  %v1773_v26 = vmul.f32 %v1652_v60, %v1669_v2  ;;  %v316_v34 = vadd.f32 %v284_v44, %v164_v21 }
  0x8a   :  { %v1715_v20 = vpop.permute.xlu0 %47  ;;  %v166_v35 = vmul.f32 %v1680_v9, %v1674_v4 }
  0x8b   :  { %v1731_v31 = vpop.permute.xlu1 %176  ;;  %v143_v45 = vmul.f32 %v1658_v62, %v1715_v20  ;;  %v163_v62 = vmul.f32 %v1652_v60, %v1674_v4  ;;  %v140_v43 = vmul.f32 %v1672_v3, %v1715_v20  ;;  %v150_v3 = vmul.f32 %v1680_v9, %v1669_v2 }
  0x8c   :  { %v271_v27 = vmul.f32 %v1639_v53, %v1731_v31  ;;  %v273_v42 = vmul.f32 %v1643_v56, %v1731_v31  ;;  %v268_v23 = vmul.f32 %v1647_v58, %v1731_v31 }
  0x8d   :  { %v295_v6 = vadd.f32 %v263_v17, %v143_v45  ;;  %v318_v45 = vadd.f32 %v286_v30, %v166_v35  ;;  %v142_v30 = vmul.f32 %v1680_v9, %v1715_v20  ;;  %v267_v9 = vmul.f32 %v1635_v51, %v1731_v31 }
  0x8e   :  { %v1755_v41 = vpop.permute.xlu0 %340  ;;  %v303_v17 = vadd.f32 %v271_v27, %v151_v7  ;;  %v270_v27 = vmul.f32 %v1649_v59, %v1731_v31  ;;  %v300_v59 = vadd.f32 %v268_v23, %v148_v46  ;;  %v141_v7 = vmul.f32 %v1655_v61, %v1715_v20 }
  0x8f   :  { %v371_v19 = vadd.f32 %v1755_v41, %v319_v47  ;;  %v373_v29 = vadd.f32 %v1755_v41, %v321_v48  ;;  %v368_v21 = vadd.f32 %v1755_v41, %v316_v34  ;;  %v370_v49 = vadd.f32 %v1755_v41, %v318_v45 }
  0x90   :  { %v1763_v50 = vpop.permute.xlu1 %335  ;;  %v302_v34 = vadd.f32 %v270_v27, %v150_v3  ;;  %v152_v46 = vmul.f32 %v1661_v63, %v1669_v2 }
  0x91   :  { %v363_v8 = vadd.f32 %v1763_v50, %v311_v54  ;;  %v365_v32 = vadd.f32 %v1763_v50, %v313_v5  ;;  %1310 = vtanh.f32 %v371_v19  ;;  %v360_v37 = vadd.f32 %v1763_v50, %v308_v11 }
  0x92   :  { %1312 = vtanh.f32 %v373_v29  ;;  %v1795_v5 = vmul.f32 %v1655_v61, %v1669_v2  ;;  %v305_v19 = vadd.f32 %v273_v42, %v153_v22  ;;  %v165_v29 = vmul.f32 %v1655_v61, %v1674_v4 }
  0x93   :  { %1314 = vtanh.f32 %v363_v8  ;;  %v362_v54 = vadd.f32 %v1763_v50, %v310_v38  ;;  %v315_v8 = vadd.f32 %v1721_v24, %v163_v62  ;;  %v359_v11 = vadd.f32 %v1763_v50, %v307_v18 }
  0x94   :  { %v1785_v33 = vpop.permute.xlu1 %325  ;;  %1316 = vtanh.f32 %v365_v32  ;;  %v317_v42 = vadd.f32 %v1725_v25, %v165_v29  ;;  %v139_v24 = vmul.f32 %v1652_v60, %v1715_v20  ;;  %v361_v32 = vadd.f32 %v1763_v50, %v309_v36 }
  0x95   :  { %v347_v53 = vadd.f32 %v1785_v33, %v295_v6  ;;  %v367_v58 = vadd.f32 %v1755_v41, %v315_v8  ;;  %v292_v6 = vadd.f32 %v1695_v14, %v140_v43  ;;  %v294_v60 = vadd.f32 %v1703_v16, %v142_v30  ;;  %v2087_v8 = vld [vmem:[#allocation8_spill] sm:$0xff] }
  0x96   :  { %v369_v18 = vadd.f32 %v1755_v41, %v317_v42  ;;  %v269_v36 = vmul.f32 %v1637_v52, %v1731_v31  ;;  %v291_v35 = vadd.f32 %v1691_v13, %v139_v24  ;;  %v168_v16 = vmul.f32 %v1661_v63, %v1674_v4  ;;  %v2089_v24 = vld [vmem:[#allocation4_spill] sm:$0xff] }
  0x97   :  { %1318 = vtanh.f32 %v347_v53  ;;  %v344_v25 = vadd.f32 %v1785_v33, %v292_v6  ;;  %v346_v61 = vadd.f32 %v1785_v33, %v294_v60  ;;  %v299_v53 = vadd.f32 %v267_v9, %v1773_v26 }
  0x98   :  { %v1804_v44 = vpop.permute.xlu1 %330  ;;  %1320 = vtanh.f32 %v360_v37  ;;  %v170_v62 = vmul.f32 %v1667_v1, %v1674_v4  ;;  %v293_v13 = vadd.f32 %v1699_v15, %v141_v7  ;;  %v301_v26 = vadd.f32 %v269_v36, %v1795_v5 }
  0x99   :  { %v355_v47 = vadd.f32 %v1804_v44, %v303_v17  ;;  %v357_v48 = vadd.f32 %v1804_v44, %v305_v19  ;;  %1322 = vtanh.f32 %v368_v21  ;;  %v352_v14 = vadd.f32 %v1804_v44, %v300_v59 }
  0x9a   :  { %v354_v52 = vadd.f32 %v1804_v44, %v302_v34  ;;  %v343_v21 = vadd.f32 %v1785_v33, %v291_v35  ;;  %v144_v19 = vmul.f32 %v1661_v63, %v1715_v20  ;;  %v351_v38 = vadd.f32 %v1804_v44, %v299_v53 }
  0x9b   :  { %1324 = vtanh.f32 %v355_v47  ;;  %v146_v4 = vmul.f32 %v1667_v1, %v1715_v20  ;;  %v345_v43 = vadd.f32 %v1785_v33, %v293_v13  ;;  %v312_v15 = vadd.f32 %v1683_v10, %v1750_v39  ;;  %v1306_v13 = vld [vmem:[%s2071_s3] sm:$0xff]  }
  0x9c   :  { %1326 = vtanh.f32 %v357_v48  ;;  %v272_v63 = vmul.f32 %v1641_v55, %v1731_v31  ;;  %v353_v47 = vadd.f32 %v1804_v44, %v301_v26  ;;  %v320_v5 = vadd.f32 %v1737_v28, %v168_v16 }
  0x9d   :  { %1328 = vtanh.f32 %v362_v54  ;;  %v274_v54 = vmul.f32 %v1645_v57, %v1731_v31  ;;  %v364_v23 = vadd.f32 %v1763_v50, %v312_v15  ;;  %v322_v3 = vadd.f32 %v2087_v8, %v170_v62  ;;  %v2088_v31 = vld [vmem:[#allocation6_spill] sm:$0xff] }
  0x9e   :  { %1330 = vtanh.f32 %v370_v49  ;;  %v1836_v51 = vpop.eup %1310  ;;  %v314_v49 = vadd.f32 %v1687_v12, %v1753_v40  ;;  %v372_v55 = vadd.f32 %v1755_v41, %v320_v5  ;;  %v145_v28 = vmul.f32 %v1664_v0, %v1715_v20  ;;  %v2090_v20 = vld [vmem:[#allocation7_spill] sm:$0xff] }
  0x9f   :  { %1332 = vtanh.f32 %v359_v11  ;;  %v1842_v22 = vpop.eup %1312  ;;  %v296_v11 = vadd.f32 %v2088_v31, %v144_v19  ;;  %v154_v12 = vmul.f32 %v1667_v1, %v1669_v2  ;;  %v374_v40 = vadd.f32 %v1755_v41, %v322_v3 }
  0xa0   :  { %1334 = vtanh.f32 %v367_v58  ;;  %v1848_v37 = vpop.eup %1314  ;;  %v366_v57 = vadd.f32 %v1763_v50, %v314_v49  ;;  %v304_v58 = vadd.f32 %v272_v63, %v152_v46  ;;  %v298_v50 = vadd.f32 %v2090_v20, %v146_v4 }
  0xa1   :  { %1336 = vtanh.f32 %v361_v32  ;;  %v1854_v17 = vpop.eup %1316  ;;  %v265_v32 = vmul.f32 %v1643_v56, %v2089_v24  ;;  %v348_v0 = vadd.f32 %v1785_v33, %v296_v11  ;;  %v306_v1 = vadd.f32 %v274_v54, %v154_v12 }
  0xa2   :  { %1338 = vtanh.f32 %v369_v18  ;;  %v356_v18 = vadd.f32 %v1804_v44, %v304_v58  ;;  %v350_v41 = vadd.f32 %v1785_v33, %v298_v50  ;;  %v2091_v5 = vmov 0  }
  0xa3   :  { %1340 = vtanh.f32 %v344_v25  ;;  %v297_v59 = vadd.f32 %v265_v32, %v145_v28  ;;  %v358_v56 = vadd.f32 %v1804_v44, %v306_v1  ;;  %v429_v54 = vpack.c.bf16 %v1842_v22, %v1854_v17  ;;  %v1926_v17 = vpop.permute.xlu0 %443 }
  0xa4   :  { %1342 = vtanh.f32 %v352_v14  ;;  %v1860_v29 = vpop.eup %1318 }
  0xa5   :  { %1344 = vtanh.f32 %v346_v61  ;;  %v1321_v45 = vpop.eup %1320  ;;  %v349_v36 = vadd.f32 %v1785_v33, %v297_v59 }
  0xa6   :  { %1346 = vtanh.f32 %v354_v52  ;;  %v1323_v48 = vpop.eup %1322 }
  0xa7   :  { %1348 = vtanh.f32 %v343_v21  ;;  %v424_v39 = vpack.c.bf16 %v1323_v48, %v1321_v45  ;;  %v427_v45 = vpack.c.bf16 %v1836_v51, %v1848_v37  ;;  %v1307_v37 = vld [vmem:[%s2071_s3 + $0x8] sm:$0xff]   ;;  %v1930_v28 = vpop.permute.xlu0 %433 }
  0xa8   :  { %v1876_v10 = vpop.eup %1324  ;;  %1350 = vtanh.f32 %v351_v38 }
  0xa9   :  { %v1880_v30 = vpop.eup %1326  ;;  %1352 = vtanh.f32 %v345_v43  ;;  %480 = vmatprep.subr.bf16.mxu0 %v424_v39  ;;  %v419_v51 = vpack.c.bf16 %v1876_v10, %v1860_v29  ;;  %v1928_v29 = vpop.permute.xlu1 %448 }
  0xaa   :  { %v1329_v27 = vpop.eup %1328  ;;  %1354 = vtanh.f32 %v353_v47 }
  0xab   :  { %v1331_v42 = vpop.eup %1330  ;;  %1356 = vtanh.f32 %v364_v23 }
  0xac   :  { %v1333_v6 = vpop.eup %1332  ;;  %v426_v9 = vpack.c.bf16 %v1331_v42, %v1329_v27  ;;  %1358 = vtanh.f32 %v372_v55 }
  0xad   :  { %v1335_v2 = vpop.eup %1334  ;;  %1360 = vtanh.f32 %v366_v57  ;;  %v1932_v11 = vpop.permute.xlu1 %438 }
  0xae   :  { %v1337_v7 = vpop.eup %1336  ;;  %533 = vmatprep.subr.bf16.mxu1 %v426_v9  ;;  %v423_v25 = vpack.c.bf16 %v1335_v2, %v1333_v6  ;;  %1362 = vtanh.f32 %v374_v40 }
  0xaf   :  { %v1339_v60 = vpop.eup %1338  ;;  %1364 = vtanh.f32 %v348_v0 }
  0xb0   :  { %v1341_v14 = vpop.eup %1340  ;;  %481 = vmatpush1.bf16.msra.mxu0 %v423_v25  ;;  %v425_v34 = vpack.c.bf16 %v1339_v60, %v1337_v7  ;;  %1366 = vtanh.f32 %v356_v18 }
  0xb1   :  { %v1343_v46 = vpop.eup %1342  ;;  %1368 = vtanh.f32 %v350_v41 }
  0xb2   :  { %v1345_v61 = vpop.eup %1344  ;;  %534 = vmatpush1.bf16.msra.mxu1 %v425_v34  ;;  %v416_v35 = vpack.c.bf16 %v1343_v46, %v1341_v14  ;;  %1370 = vtanh.f32 %v358_v56 }
  0xb3   :  { %v1347_v16 = vpop.eup %1346  ;;  %1372 = vtanh.f32 %v349_v36 }
  0xb4   :  { %v1349_v52 = vpop.eup %1348  ;;  %482 = vmatprep.subr.bf16.mxu0 %v416_v35  ;;  %v418_v53 = vpack.c.bf16 %v1347_v16, %v1345_v61 }
  0xb5   :  { %v1351_v44 = vpop.eup %1350 }
  0xb6   :  { %v1353_v62 = vpop.eup %1352  ;;  %535 = vmatprep.subr.bf16.mxu1 %v418_v53  ;;  %v415_v33 = vpack.c.bf16 %v1351_v44, %v1349_v52 }
  0xb7   :  { %v1355_v21 = vpop.eup %1354 }
  0xb8   :  { %v1357_v19 = vpop.eup %1356  ;;  %483 = vmatpush1.bf16.msra.mxu0 %v415_v33  ;;  %v417_v38 = vpack.c.bf16 %v1355_v21, %v1353_v62 }
  0xb9   :  { %v1359_v26 = vpop.eup %1358 }
  0xba   :  { %v1361_v4 = vpop.eup %1360  ;;  %536 = vmatpush1.bf16.msra.mxu1 %v417_v38  ;;  %v428_v43 = vpack.c.bf16 %v1359_v26, %v1357_v19 }
  0xbb   :  { %v1363_v15 = vpop.eup %1362  ;;  %1275 = vmatmul.mubr.msk.bf16.vlgmr.msra.gmra.mxu0 %vm461_vm0, %v1306_v13 }
  0xbc   :  { %v1365_v63 = vpop.eup %1364  ;;  %586 = vmatprep.subr.bf16.mxu0 %v428_v43  ;;  %v430_v47 = vpack.c.bf16 %v1363_v15, %v1361_v4  ;;  %510 = vmatprep.mubr.bf16.mxu0 %v2091_v5 }
  0xbd   :  { %v1367_v48 = vpop.eup %1366  ;;  %1277 = vmatmul.mubr.msk.bf16.vlgmr.msra.gmra.mxu1 %vm461_vm0, %v1306_v13  ;;  %587 = vmatpush1.bf16.msra.mxu0 %v427_v45 }
  0xbe   :  { %v1369_v23 = vpop.eup %1368  ;;  %639 = vmatprep.subr.bf16.mxu1 %v430_v47  ;;  %v420_v49 = vpack.c.bf16 %v1367_v48, %v1365_v63  ;;  %563 = vmatprep.mubr.bf16.mxu1 %v2091_v5 }
  0xbf   :  { %v1371_v39 = vpop.eup %1370  ;;  %640 = vmatpush1.bf16.msra.mxu1 %v429_v54 }
  0xc0   :  { %v1373_v55 = vpop.eup %1372  ;;  %588 = vmatprep.subr.bf16.mxu0 %v420_v49  ;;  %v422_v8 = vpack.c.bf16 %v1371_v39, %v1369_v23 }
  0xc1   :  { %589 = vmatpush1.bf16.msra.mxu0 %v419_v51  ;;  %v421_v22 = vpack.c.bf16 %v1880_v30, %v1373_v55 }
  0xc2   :  { %641 = vmatprep.subr.bf16.mxu1 %v422_v8 }
  0xc3   :  { %642 = vmatpush1.bf16.msra.mxu1 %v421_v22  ;;  %1276 = vmatmul.mubr.msk.bf16.gmra.mxu0 %vm461_vm0, %v1307_v37 }
  0xc4   :  { %606 = vmatprep.mubr.bf16.mxu0 %v2091_v5 }
  0xc5   :  { %1278 = vmatmul.mubr.msk.bf16.gmra.mxu1 %vm461_vm0, %v1307_v37 }
  0xc6   :  { %659 = vmatprep.mubr.bf16.mxu1 %v2091_v5 }
  0xcb   :  { %1279 = vmatmul.mubr.msk.bf16.vlgmr.msra.gmra.mxu0 %vm461_vm0, %v1306_v13 }
  0xcc   :  { %616 = vmatprep.mubr.bf16.mxu0 %v2091_v5 }
  0xcd   :  { %1281 = vmatmul.mubr.msk.bf16.vlgmr.msra.gmra.mxu1 %vm461_vm0, %v1306_v13 }
  0xce   :  { %669 = vmatprep.mubr.bf16.mxu1 %v2091_v5 }
  0xd3   :  { %1280 = vmatmul.mubr.msk.bf16.gmra.mxu0 %vm461_vm0, %v1307_v37 }
  0xd4   :  { %804 = vmatprep.mubr.bf16.mxu0 %v2091_v5 }
  0xd5   :  { %1282 = vmatmul.mubr.msk.bf16.gmra.mxu1 %vm461_vm0, %v1307_v37 }
  0xd6   :  { %857 = vmatprep.mubr.bf16.mxu1 %v2091_v5 }
 0x17b   :  { %v502_v10 = vpop.f32.mrf.mxu0 }
 0x17c   :  { %v503_v52 = vadd.f32 %v502_v10, %v1930_v28 }
 0x17d   :  { %v555_v3 = vpop.f32.mrf.mxu1  ;;  %v504_v30 = vpop.f32.mrf.mxu0 }
 0x17e   :  { %v505_v27 = vadd.f32 %v504_v30, %v1930_v28  ;;  %v556_v53 = vadd.f32 %v555_v3, %v1930_v28 }
 0x17f   :  { %v557_v57 = vpop.f32.mrf.mxu1  ;;  %v506_v31 = vpop.f32.mrf.mxu0 }
 0x180   :  { %v558_v12 = vadd.f32 %v557_v57, %v1930_v28  ;;  %1374 = vtanh.f32 %v505_v27  ;;  %v507_v34 = vadd.f32 %v506_v31, %v1932_v11 }
 0x181   :  { %v559_v40 = vpop.f32.mrf.mxu1  ;;  %v508_v58 = vpop.f32.mrf.mxu0 }
 0x182   :  { %v509_v42 = vadd.f32 %v508_v58, %v1932_v11  ;;  %1376 = vtanh.f32 %v558_v12  ;;  %v560_v61 = vadd.f32 %v559_v40, %v1932_v11 }
 0x183   :  { %v561_v24 = vpop.f32.mrf.mxu1  ;;  %v512_v32 = vpop.f32.mrf.mxu0 }
 0x184   :  { %v562_v0 = vadd.f32 %v561_v24, %v1932_v11  ;;  %v513_v20 = vadd.f32 %v512_v32, %v1926_v17  ;;  %1378 = vtanh.f32 %v509_v42 }
 0x185   :  { %v565_v50 = vpop.f32.mrf.mxu1  ;;  %v514_v6 = vpop.f32.mrf.mxu0 }
 0x186   :  { %v515_v9 = vadd.f32 %v514_v6, %v1926_v17  ;;  %1380 = vtanh.f32 %v562_v0  ;;  %v566_v60 = vadd.f32 %v565_v50, %v1926_v17 }
 0x187   :  { %v567_v18 = vpop.f32.mrf.mxu1  ;;  %v516_v1 = vpop.f32.mrf.mxu0  ;;  %1382 = vtanh.f32 %v513_v20 }
 0x188   :  { %v568_v2 = vadd.f32 %v567_v18, %v1926_v17  ;;  %v517_v59 = vadd.f32 %v516_v1, %v1928_v29  ;;  %1384 = vtanh.f32 %v515_v9 }
 0x189   :  { %v569_v41 = vpop.f32.mrf.mxu1  ;;  %v518_v7 = vpop.f32.mrf.mxu0 }
 0x18a   :  { %1386 = vtanh.f32 %v568_v2  ;;  %v570_v25 = vadd.f32 %v569_v41, %v1928_v29  ;;  %v519_v56 = vadd.f32 %v518_v7, %v1928_v29 }
 0x18b   :  { %1388 = vtanh.f32 %v517_v59  ;;  %v571_v36 = vpop.f32.mrf.mxu1  ;;  %v1945_v14 = vpop.f32.mrf.mxu0 }
 0x18c   :  { %1390 = vtanh.f32 %v570_v25  ;;  %v572_v46 = vadd.f32 %v571_v36, %v1928_v29 }
 0x18d   :  { %1392 = vtanh.f32 %v519_v56  ;;  %v1950_v35 = vpop.f32.mrf.mxu1  ;;  %v610_v16 = vpop.f32.mrf.mxu0 }
 0x18e   :  { %1394 = vtanh.f32 %v572_v46  ;;  %v611_v33 = vadd.f32 %v610_v16, %v1930_v28  ;;  %v1955_v21 = vpop.eup %1374  ;;  %v662_v25 = vadd.f32 %v1950_v35, %v1930_v28 }
 0x18f   :  { %1396 = vtanh.f32 %v566_v60  ;;  %v663_v44 = vpop.f32.mrf.mxu1  ;;  %v612_v62 = vpop.f32.mrf.mxu0 }
 0x190   :  { %1398 = vtanh.f32 %v507_v34  ;;  %v664_v13 = vadd.f32 %v663_v44, %v1930_v28  ;;  %v1958_v26 = vpop.eup %1376  ;;  %v613_v42 = vadd.f32 %v612_v62, %v1932_v11  ;;  %v1309_v44 = vld [vmem:[%s2073_s5 + $0x8] sm:$0xff]  }
 0x191   :  { %1400 = vtanh.f32 %v560_v61  ;;  %v665_v19 = vpop.f32.mrf.mxu1  ;;  %v614_v38 = vpop.f32.mrf.mxu0 }
 0x192   :  { %1402 = vtanh.f32 %v503_v52  ;;  %v615_v4 = vadd.f32 %v614_v38, %v1932_v11  ;;  %v1379_v43 = vpop.eup %1378  ;;  %v666_v1 = vadd.f32 %v665_v19, %v1932_v11 }
 0x193   :  { %1404 = vtanh.f32 %v556_v53  ;;  %v667_v15 = vpop.f32.mrf.mxu1  ;;  %v618_v45 = vpop.f32.mrf.mxu0  ;;  %v721_v59 = vpack.c.bf16 %v1379_v43, %v1955_v21 }
 0x194   :  { %v1381_v63 = vpop.eup %1380  ;;  %1406 = vtanh.f32 %v611_v33  ;;  %v668_v47 = vadd.f32 %v667_v15, %v1932_v11  ;;  %v619_v48 = vadd.f32 %v618_v45, %v1926_v17 }
 0x195   :  { %v1383_v54 = vpop.eup %1382  ;;  %1408 = vtanh.f32 %v664_v13  ;;  %v671_v23 = vpop.f32.mrf.mxu1  ;;  %v723_v7 = vpack.c.bf16 %v1381_v63, %v1958_v26 }
 0x196   :  { %v620_v49 = vpop.f32.mrf.mxu0  ;;  %v1385_v39 = vpop.eup %1384  ;;  %1410 = vtanh.f32 %v615_v4  ;;  %v672_v24 = vadd.f32 %v671_v23, %v1926_v17 }
 0x197   :  { %v621_v51 = vadd.f32 %v620_v49, %v1926_v17  ;;  %v1387_v37 = vpop.eup %1386  ;;  %1412 = vtanh.f32 %v668_v47  ;;  %v673_v55 = vpop.f32.mrf.mxu1 }
 0x198   :  { %v622_v8 = vpop.f32.mrf.mxu0  ;;  %v1389_v22 = vpop.eup %1388  ;;  %1414 = vtanh.f32 %v619_v48  ;;  %v674_v10 = vadd.f32 %v673_v55, %v1926_v17  ;;  %v609_v17 = vadd.f32 %v1945_v14, %v1930_v28  ;;  %v1308_v14 = vld [vmem:[%s2073_s5] sm:$0xff]  }
 0x199   :  { %v623_v3 = vadd.f32 %v622_v8, %v1928_v29  ;;  %v1391_v30 = vpop.eup %1390  ;;  %1416 = vtanh.f32 %v621_v51  ;;  %v675_v57 = vpop.f32.mrf.mxu1  ;;  %v728_v9 = vpack.c.bf16 %v1389_v22, %v1383_v54 }
 0x19a   :  { %v624_v31 = vpop.f32.mrf.mxu0  ;;  %v1393_v27 = vpop.eup %1392  ;;  %1418 = vtanh.f32 %v674_v10  ;;  %v676_v12 = vadd.f32 %v675_v57, %v1928_v29 }
 0x19b   :  { %v625_v40 = vadd.f32 %v624_v31, %v1928_v29  ;;  %v1395_v58 = vpop.eup %1394  ;;  %1420 = vtanh.f32 %v623_v3  ;;  %v677_v32 = vpop.f32.mrf.mxu1  ;;  %v729_v0 = vpack.c.bf16 %v1393_v27, %v1385_v39 }
 0x19c   :  { %v1397_v20 = vpop.eup %1396  ;;  %1422 = vtanh.f32 %v676_v12  ;;  %v678_v50 = vadd.f32 %v677_v32, %v1928_v29  ;;  %v731_v6 = vpack.c.bf16 %v1395_v58, %v1387_v37  ;;  %v2000_v23 = vpop.permute.xlu0 %748 }
 0x19d   :  { %v1399_v18 = vpop.eup %1398  ;;  %1424 = vtanh.f32 %v625_v40  ;;  %784 = vmatprep.subr.bf16.mxu0 %v729_v0  ;;  %v730_v2 = vpack.c.bf16 %v1391_v30, %v1397_v20  ;;  %v2002_v49 = vpop.permute.xlu1 %753 }
 0x19e   :  { %v1401_v41 = vpop.eup %1400  ;;  %1426 = vtanh.f32 %v678_v50  ;;  %837 = vmatprep.subr.bf16.mxu1 %v731_v6  ;;  %785 = vmatpush1.bf16.msra.mxu0 %v728_v9 }
 0x19f   :  { %v1403_v29 = vpop.eup %1402  ;;  %1428 = vtanh.f32 %v672_v24  ;;  %838 = vmatpush1.bf16.msra.mxu1 %v730_v2  ;;  %786 = vmatprep.subr.bf16.mxu0 %v721_v59 }
 0x1a0   :  { %v1405_v11 = vpop.eup %1404  ;;  %1430 = vtanh.f32 %v613_v42  ;;  %839 = vmatprep.subr.bf16.mxu1 %v723_v7  ;;  %v720_v56 = vpack.c.bf16 %v1399_v18, %v1403_v29  ;;  %v2004_v55 = vpop.permute.xlu0 %738 }
 0x1a1   :  { %v1407_v60 = vpop.eup %1406  ;;  %1432 = vtanh.f32 %v666_v1  ;;  %v722_v36 = vpack.c.bf16 %v1401_v41, %v1405_v11  ;;  %v2008_v57 = vpop.permute.xlu1 %743 }
 0x1a2   :  { %v1409_v34 = vpop.eup %1408  ;;  %1434 = vtanh.f32 %v609_v17  ;;  %787 = vmatpush1.bf16.msra.mxu0 %v720_v56 }
 0x1a3   :  { %v1411_v46 = vpop.eup %1410  ;;  %1436 = vtanh.f32 %v662_v25  ;;  %840 = vmatpush1.bf16.msra.mxu1 %v722_v36 }
 0x1a4   :  { %v1413_v28 = vpop.eup %1412  ;;  %v725_v15 = vpack.c.bf16 %v1411_v46, %v1407_v60 }
 0x1a5   :  { %v1415_v61 = vpop.eup %1414  ;;  %1285 = vmatmul.mubr.msk.bf16.vlgmr.msra.gmra.mxu0 %vm461_vm0, %v1308_v14  ;;  %v727_v45 = vpack.c.bf16 %v1413_v28, %v1409_v34 }
 0x1a6   :  { %v1417_v35 = vpop.eup %1416  ;;  %1287 = vmatmul.mubr.msk.bf16.vlgmr.msra.gmra.mxu1 %vm461_vm0, %v1308_v14  ;;  %814 = vmatprep.mubr.bf16.mxu0 %v2091_v5 }
 0x1a7   :  { %v1419_v16 = vpop.eup %1418  ;;  %867 = vmatprep.mubr.bf16.mxu1 %v2091_v5 }
 0x1a8   :  { %v1421_v52 = vpop.eup %1420 }
 0x1a9   :  { %v1423_v53 = vpop.eup %1422  ;;  %v732_v26 = vpack.c.bf16 %v1421_v52, %v1415_v61 }
 0x1aa   :  { %v1425_v62 = vpop.eup %1424 }
 0x1ab   :  { %v1427_v33 = vpop.eup %1426  ;;  %v733_v21 = vpack.c.bf16 %v1425_v62, %v1417_v35 }
 0x1ac   :  { %v1429_v13 = vpop.eup %1428  ;;  %v735_v19 = vpack.c.bf16 %v1427_v33, %v1419_v16 }
 0x1ad   :  { %v1431_v38 = vpop.eup %1430  ;;  %1286 = vmatmul.mubr.msk.bf16.gmra.mxu0 %vm461_vm0, %v1309_v44  ;;  %890 = vmatprep.subr.bf16.mxu0 %v733_v21  ;;  %v734_v4 = vpack.c.bf16 %v1423_v53, %v1429_v13 }
 0x1ae   :  { %v1433_v43 = vpop.eup %1432  ;;  %1288 = vmatmul.mubr.msk.bf16.gmra.mxu1 %vm461_vm0, %v1309_v44  ;;  %943 = vmatprep.subr.bf16.mxu1 %v735_v19 }
 0x1af   :  { %v1435_v63 = vpop.eup %1434  ;;  %891 = vmatpush1.bf16.msra.mxu0 %v732_v26  ;;  %944 = vmatpush1.bf16.msra.mxu1 %v734_v4 }
 0x1b0   :  { %v1437_v47 = vpop.eup %1436  ;;  %892 = vmatprep.subr.bf16.mxu0 %v725_v15  ;;  %945 = vmatprep.subr.bf16.mxu1 %v727_v45  ;;  %v724_v48 = vpack.c.bf16 %v1431_v38, %v1435_v63 }
 0x1b1   :  { %v726_v54 = vpack.c.bf16 %v1433_v43, %v1437_v47  ;;  %910 = vmatprep.mubr.bf16.mxu0 %v2091_v5  ;;  %963 = vmatprep.mubr.bf16.mxu1 %v2091_v5 }
 0x1b3   :  { %893 = vmatpush1.bf16.msra.mxu0 %v724_v48  ;;  %946 = vmatpush1.bf16.msra.mxu1 %v726_v54 }
 0x1b6   :  { %1289 = vmatmul.mubr.msk.bf16.vlgmr.msra.gmra.mxu0 %vm461_vm0, %v1308_v14  ;;  %1291 = vmatmul.mubr.msk.bf16.vlgmr.msra.gmra.mxu1 %vm461_vm0, %v1308_v14 }
 0x1b7   :  { %920 = vmatprep.mubr.bf16.mxu0 %v2091_v5  ;;  %973 = vmatprep.mubr.bf16.mxu1 %v2091_v5 }
 0x1be   :  { %1290 = vmatmul.mubr.msk.bf16.gmra.mxu0 %vm461_vm0, %v1309_v44  ;;  %1292 = vmatmul.mubr.msk.bf16.gmra.mxu1 %vm461_vm0, %v1309_v44 }
 0x1bf   :  { %1078 = vmatprep.mubr.bf16.mxu0 %v2091_v5  ;;  %1119 = vmatprep.mubr.bf16.mxu1 %v2091_v5 }
 0x265   :  { %v806_v39 = vpop.f32.mrf.mxu0 }
 0x266   :  { %v859_v51 = vpop.f32.mrf.mxu1  ;;  %v807_v60 = vadd.f32 %v806_v39, %v2004_v55 }
 0x267   :  { %v808_v37 = vpop.f32.mrf.mxu0  ;;  %v860_v36 = vadd.f32 %v859_v51, %v2004_v55 }
 0x268   :  { %v861_v8 = vpop.f32.mrf.mxu1  ;;  %v809_v22 = vadd.f32 %v808_v37, %v2004_v55 }
 0x269   :  { %v810_v10 = vpop.f32.mrf.mxu0  ;;  %v862_v3 = vadd.f32 %v861_v8, %v2004_v55 }
 0x26a   :  { %v863_v30 = vpop.f32.mrf.mxu1  ;;  %1438 = vtanh.f32 %v809_v22  ;;  %v811_v7 = vadd.f32 %v810_v10, %v2008_v57 }
 0x26b   :  { %v812_v31 = vpop.f32.mrf.mxu0  ;;  %1440 = vtanh.f32 %v862_v3  ;;  %v864_v25 = vadd.f32 %v863_v30, %v2008_v57 }
 0x26c   :  { %v813_v27 = vadd.f32 %v812_v31, %v2008_v57  ;;  %v865_v12 = vpop.f32.mrf.mxu1 }
 0x26d   :  { %v866_v40 = vadd.f32 %v865_v12, %v2008_v57  ;;  %v816_v58 = vpop.f32.mrf.mxu0 }
 0x26e   :  { %v817_v42 = vadd.f32 %v816_v58, %v2000_v23  ;;  %v869_v24 = vpop.f32.mrf.mxu1  ;;  %1442 = vtanh.f32 %v813_v27 }
 0x26f   :  { %v818_v32 = vpop.f32.mrf.mxu0  ;;  %1444 = vtanh.f32 %v866_v40  ;;  %v870_v59 = vadd.f32 %v869_v24, %v2000_v23 }
 0x270   :  { %v819_v0 = vadd.f32 %v818_v32, %v2000_v23  ;;  %v871_v20 = vpop.f32.mrf.mxu1  ;;  %1446 = vtanh.f32 %v817_v42 }
 0x271   :  { %v872_v50 = vadd.f32 %v871_v20, %v2000_v23  ;;  %v820_v6 = vpop.f32.mrf.mxu0 }
 0x272   :  { %1448 = vtanh.f32 %v819_v0  ;;  %v821_v9 = vadd.f32 %v820_v6, %v2002_v49  ;;  %v873_v18 = vpop.f32.mrf.mxu1 }
 0x273   :  { %1450 = vtanh.f32 %v872_v50  ;;  %v874_v1 = vadd.f32 %v873_v18, %v2002_v49  ;;  %v822_v2 = vpop.f32.mrf.mxu0 }
 0x274   :  { %1452 = vtanh.f32 %v821_v9  ;;  %v823_v41 = vadd.f32 %v822_v2, %v2002_v49  ;;  %v875_v17 = vpop.f32.mrf.mxu1 }
 0x275   :  { %1454 = vtanh.f32 %v874_v1  ;;  %v876_v29 = vadd.f32 %v875_v17, %v2002_v49 }
 0x276   :  { %1456 = vtanh.f32 %v823_v41  ;;  %v2022_v11 = vpop.f32.mrf.mxu0  ;;  %v2024_v56 = vpop.f32.mrf.mxu1 }
 0x277   :  { %1458 = vtanh.f32 %v876_v29  ;;  %v2028_v46 = vpop.eup %1438 }
 0x278   :  { %1460 = vtanh.f32 %v870_v59  ;;  %v914_v14 = vpop.f32.mrf.mxu0  ;;  %v967_v34 = vpop.f32.mrf.mxu1  ;;  %v966_v59 = vadd.f32 %v2024_v56, %v2004_v55 }
 0x279   :  { %1462 = vtanh.f32 %v811_v7  ;;  %v915_v28 = vadd.f32 %v914_v14, %v2004_v55  ;;  %v2031_v16 = vpop.eup %1440  ;;  %v968_v52 = vadd.f32 %v967_v34, %v2004_v55  ;;  %v1016_v7 = vld [vmem:[%s2074_s7] sm:$0x1] }
 0x27a   :  { %1464 = vtanh.f32 %v864_v25  ;;  %v916_v61 = vpop.f32.mrf.mxu0  ;;  %v969_v35 = vpop.f32.mrf.mxu1 }
 0x27b   :  { %1466 = vtanh.f32 %v807_v60  ;;  %v1443_v53 = vpop.eup %1442  ;;  %v917_v20 = vadd.f32 %v916_v61, %v2008_v57  ;;  %v970_v9 = vadd.f32 %v969_v35, %v2008_v57 }
 0x27c   :  { %1468 = vtanh.f32 %v860_v36  ;;  %v918_v44 = vpop.f32.mrf.mxu0  ;;  %v971_v62 = vpop.f32.mrf.mxu1 }
 0x27d   :  { %v1445_v33 = vpop.eup %1444  ;;  %v919_v21 = vadd.f32 %v918_v44, %v2008_v57  ;;  %v972_v13 = vadd.f32 %v971_v62, %v2008_v57  ;;  %1470 = vtanh.f32 %v915_v28 }
 0x27e   :  { %v1447_v19 = vpop.eup %1446  ;;  %v922_v38 = vpop.f32.mrf.mxu0  ;;  %1472 = vtanh.f32 %v968_v52  ;;  %v1021_v18 = vpack.c.bf16 %v1445_v33, %v2031_v16 }
 0x27f   :  { %v975_v26 = vpop.f32.mrf.mxu1  ;;  %v1449_v4 = vpop.eup %1448  ;;  %v923_v43 = vadd.f32 %v922_v38, %v2000_v23  ;;  %1474 = vtanh.f32 %v919_v21 }
 0x280   :  { %v1451_v15 = vpop.eup %1450  ;;  %v924_v45 = vpop.f32.mrf.mxu0  ;;  %1476 = vtanh.f32 %v972_v13  ;;  %v976_v30 = vadd.f32 %v975_v26, %v2000_v23 }
 0x281   :  { %v977_v63 = vpop.f32.mrf.mxu1  ;;  %v1453_v47 = vpop.eup %1452  ;;  %v925_v48 = vadd.f32 %v924_v45, %v2000_v23  ;;  %1478 = vtanh.f32 %v923_v43 }
 0x282   :  { %v978_v54 = vadd.f32 %v977_v63, %v2000_v23  ;;  %v1455_v39 = vpop.eup %1454  ;;  %v926_v51 = vpop.f32.mrf.mxu0  ;;  %v1026_v40 = vpack.c.bf16 %v1453_v47, %v1447_v19  ;;  %v1019_v23 = vpack.c.bf16 %v1443_v53, %v2028_v46 }
 0x283   :  { %v979_v37 = vpop.f32.mrf.mxu1  ;;  %v1457_v8 = vpop.eup %1456  ;;  %1480 = vtanh.f32 %v925_v48  ;;  %v927_v22 = vadd.f32 %v926_v51, %v2002_v49  ;;  %v2092_v51 = vld [vmem:[#allocation5_spill] sm:$0xff] }
 0x284   :  { %v980_v10 = vadd.f32 %v979_v37, %v2002_v49  ;;  %v1459_v3 = vpop.eup %1458  ;;  %1482 = vtanh.f32 %v978_v54  ;;  %v928_v31 = vpop.f32.mrf.mxu0  ;;  %v1027_v12 = vpack.c.bf16 %v1457_v8, %v1449_v4  ;;  %v1504_v54 = vmov 1966171168  }
 0x285   :  { %v981_v27 = vpop.f32.mrf.mxu1  ;;  %v1461_v58 = vpop.eup %1460  ;;  %1484 = vtanh.f32 %v927_v22  ;;  %v929_v42 = vadd.f32 %v928_v31, %v2002_v49  ;;  %v1029_v32 = vpack.c.bf16 %v1459_v3, %v1451_v15 }
 0x286   :  { %v982_v24 = vadd.f32 %v981_v27, %v2002_v49  ;;  %v1463_v0 = vpop.eup %1462  ;;  %1486 = vtanh.f32 %v980_v10  ;;  %1058 = vmatprep.subr.bf16.mxu0 %v1027_v12  ;;  %v1028_v50 = vpack.c.bf16 %v1455_v39, %v1461_v58  ;;  %v913_v49 = vadd.f32 %v2022_v11, %v2004_v55  ;;  %v1037_v48 = vpop.permute.xlu0 %1036  ;;  %v2093_v27 = vld [vmem:[#allocation3_spill] sm:$0xff] }
 0x287   :  { %v1465_v6 = vpop.eup %1464  ;;  %1488 = vtanh.f32 %v929_v42  ;;  %1099 = vmatprep.subr.bf16.mxu1 %v1029_v32  ;;  %1059 = vmatpush1.bf16.msra.mxu0 %v1026_v40  ;;  %v1223_v39 = vunpack.c.l.s4 %v1504_v54  ;;  %v1042_v37 = vrot.slane %v1037_v48, %v2092_v51 }
 0x288   :  { %v1467_v1 = vpop.eup %1466  ;;  %1490 = vtanh.f32 %v982_v24  ;;  %1100 = vmatpush1.bf16.msra.mxu1 %v1028_v50  ;;  %1060 = vmatprep.subr.bf16.mxu0 %v1019_v23 }
 0x289   :  { %v1469_v2 = vpop.eup %1468  ;;  %1492 = vtanh.f32 %v976_v30  ;;  %1101 = vmatprep.subr.bf16.mxu1 %v1021_v18  ;;  %v1018_v41 = vpack.c.bf16 %v1463_v0, %v1467_v1  ;;  %v1224_v22 = vunpack.c.0.s8 %v1223_v39 }
 0x28a   :  { %1494 = vtanh.f32 %v917_v20  ;;  %v1020_v57 = vpack.c.bf16 %v1465_v6, %v1469_v2  ;;  %v1471_v17 = vpop.eup %1470 }
 0x28b   :  { %1496 = vtanh.f32 %v970_v9  ;;  %1061 = vmatpush1.bf16.msra.mxu0 %v1018_v41  ;;  %v1473_v29 = vpop.eup %1472  ;;  %v1227_v12 = vsub.s32 %v1224_v22, %v2093_v27 }
 0x28c   :  { %1498 = vtanh.f32 %v913_v49  ;;  %1102 = vmatpush1.bf16.msra.mxu1 %v1020_v57  ;;  %v1475_v25 = vpop.eup %1474 }
 0x28d   :  { %1500 = vtanh.f32 %v966_v59  ;;  %v1477_v11 = vpop.eup %1476  ;;  %v1023_v44 = vpack.c.bf16 %v1475_v25, %v1471_v17 }
 0x28e   :  { %1293 = vmatmul.mubr.msk.bf16.vlgmr.msra.gmra.mxu0 %vm461_vm0, %v1016_v7  ;;  %v1479_v55 = vpop.eup %1478  ;;  %v1025_v33 = vpack.c.bf16 %v1477_v11, %v1473_v29 }
 0x28f   :  { %1294 = vmatmul.mubr.msk.bf16.vlgmr.msra.gmra.mxu1 %vm461_vm0, %v1016_v7  ;;  %1160 = vmatprep.mubr.bf16.mxu0 %v2091_v5 }
 0x290   :  { %v1481_v56 = vpop.eup %1480  ;;  %1201 = vmatprep.mubr.bf16.mxu1 %v2091_v5 }
 0x291   :  { %v1483_v60 = vpop.eup %1482 }
 0x292   :  { %v1485_v36 = vpop.eup %1484 }
 0x293   :  { %v1487_v14 = vpop.eup %1486  ;;  %v1030_v16 = vpack.c.bf16 %v1485_v36, %v1479_v55 }
 0x294   :  { %v1489_v34 = vpop.eup %1488 }
 0x295   :  { %v1491_v46 = vpop.eup %1490  ;;  %v1031_v28 = vpack.c.bf16 %v1489_v34, %v1481_v56 }
 0x296   :  { %v1493_v61 = vpop.eup %1492  ;;  %v1033_v35 = vpack.c.bf16 %v1491_v46, %v1483_v60 }
 0x297   :  { %v1495_v52 = vpop.eup %1494  ;;  %1140 = vmatprep.subr.bf16.mxu0 %v1031_v28  ;;  %v1032_v53 = vpack.c.bf16 %v1487_v14, %v1493_v61 }
 0x298   :  { %v1497_v62 = vpop.eup %1496  ;;  %1181 = vmatprep.subr.bf16.mxu1 %v1033_v35  ;;  %1141 = vmatpush1.bf16.msra.mxu0 %v1030_v16 }
 0x299   :  { %v1499_v21 = vpop.eup %1498  ;;  %1182 = vmatpush1.bf16.msra.mxu1 %v1032_v53  ;;  %1142 = vmatprep.subr.bf16.mxu0 %v1023_v44 }
 0x29a   :  { %v1501_v5 = vpop.eup %1500  ;;  %1183 = vmatprep.subr.bf16.mxu1 %v1025_v33  ;;  %v1022_v13 = vpack.c.bf16 %v1495_v52, %v1499_v21 }
 0x29b   :  { %v1024_v19 = vpack.c.bf16 %v1497_v62, %v1501_v5 }
 0x29c   :  { %1143 = vmatpush1.bf16.msra.mxu0 %v1022_v13 }
 0x29d   :  { %1184 = vmatpush1.bf16.msra.mxu1 %v1024_v19 }
 0x29f   :  { %1295 = vmatmul.mubr.msk.bf16.vlgmr.msra.gmra.mxu0 %vm461_vm0, %v1016_v7 }
 0x2a0   :  { %1296 = vmatmul.mubr.msk.bf16.vlgmr.msra.gmra.mxu1 %vm461_vm0, %v1016_v7 }
 0x34e   :  { %v1080_v38 = vpop.f32.mrf.mxu0 }
 0x34f   :  { %v1121_v26 = vpop.f32.mrf.mxu1  ;;  %v1081_v3 = vadd.f32 %v1080_v38, %v1042_v37 }
 0x350   :  { %v1082_v4 = vpop.f32.mrf.mxu0  ;;  %v1122_v30 = vadd.f32 %v1121_v26, %v1042_v37 }
 0x351   :  { %v1123_v43 = vpop.f32.mrf.mxu1  ;;  %v1083_v8 = vadd.f32 %v1082_v4, %v1042_v37 }
 0x352   :  { %v1084_v15 = vpop.f32.mrf.mxu0  ;;  %v1124_v10 = vadd.f32 %v1123_v43, %v1042_v37 }
 0x353   :  { %v1125_v45 = vpop.f32.mrf.mxu1  ;;  %v1218_v31 = vcombine.low %v1081_v3, %v1083_v8 }
 0x354   :  { %v1085_v63 = vpop.f32.mrf.mxu0  ;;  %v1219_v40 = vcombine.low %v1122_v30, %v1124_v10 }
 0x355   :  { %v1126_v47 = vpop.f32.mrf.mxu1  ;;  %v1228_v50 = vrot.slane %v1218_v31, %v1227_v12 }
 0x356   :  { %v1235_v23 = vrot.slane %v1219_v40, %v1227_v12 }
 0x358   :  { %v1250_v17 = vcombine.low %v1228_v50, %v1235_v23 }
 0x35a   :  { %v1258_v25 = vrot.slane %v1250_v17, %v1227_v12 }
 0x35f   :  { %v1162_v58 = vpop.f32.mrf.mxu0 }
 0x360   :  { %v1203_v42 = vpop.f32.mrf.mxu1  ;;  %v1163_v32 = vadd.f32 %v1162_v58, %v1042_v37 }
 0x361   :  { %v1164_v24 = vpop.f32.mrf.mxu0  ;;  %v1204_v6 = vadd.f32 %v1203_v42, %v1042_v37 }
 0x362   :  { %v1165_v0 = vadd.f32 %v1164_v24, %v1042_v37  ;;  %v1205_v20 = vpop.f32.mrf.mxu1 }
 0x363   :  { %v1206_v9 = vadd.f32 %v1205_v20, %v1042_v37  ;;  %v1166_v18 = vpop.f32.mrf.mxu0 }
 0x364   :  { %v1220_v1 = vcombine.low %v1163_v32, %v1165_v0  ;;  %v1207_v49 = vpop.f32.mrf.mxu1 }
 0x365   :  { %v1221_v2 = vcombine.low %v1204_v6, %v1206_v9  ;;  %v1167_v59 = vpop.f32.mrf.mxu0 }
 0x366   :  { %v1242_v41 = vrot.slane %v1220_v1, %v1227_v12  ;;  %v1208_v57 = vpop.f32.mrf.mxu1 }
 0x367   :  { %v1249_v7 = vrot.slane %v1221_v2, %v1227_v12 }
 0x369   :  { %v1251_v29 = vcombine.low %v1242_v41, %v1249_v7 }
 0x36b   :  { %v1265_v11 = vrot.slane %v1251_v29, %v1227_v12 }
 0x36d   :  { %v1266_v55 = vcombine.low %v1258_v25, %v1265_v11 }
 0x36f   :  { %1268 = vst [vmem:[%s2075_s9] sm:$0xff] %v1266_v55 }

</bundles_post_ra>
